<compile_context>
chip_gen: v7x
topology: tpu7x:2x2x1
jax: 0.10.0
libtpu: 0.0.40
codegen_flags: <defaults>
</compile_context>

<pallas_src>
import jax
import jax.numpy as jnp
from jax.experimental import pallas as pl
from jax.experimental.pallas import tpu as pltpu


def _round_up(n: int, m: int) -> int:
    return ((n + m - 1) // m) * m


def _sublane_multiple(dtype) -> int:
    itemsize = jnp.dtype(dtype).itemsize
    if itemsize == 2:
        return 16
    if itemsize == 1:
        return 32
    return 8


# ---------------------------------------------------------------------------
# Kernel: one batch tile -> fused Linear+ReLU, then fused (mu|logvar) head.
# ---------------------------------------------------------------------------
def encoder_kernel(x_ref, w1_ref, b1_ref, wh_ref, bh_ref, mu_ref, lv_ref):
    # Feed the MXU in the (pre-chosen) weight dtype; in-kernel cast is cheap
    # VPU work and avoids a wrapper-side x round-trip. Accumulate in f32.
    lhs = x_ref[...].astype(w1_ref.dtype)
    h = jnp.dot(lhs, w1_ref[...], preferred_element_type=jnp.float32)
    h = jnp.maximum(h + b1_ref[...], 0.0)
    # Second matmul fed in the weight dtype as well (bf16 stays bf16, f32 f32).
    h = h.astype(wh_ref.dtype)
    y = jnp.dot(h, wh_ref[...], preferred_element_type=jnp.float32) + bh_ref[...]
    o_half = mu_ref.shape[-1]  # 128-aligned, so these slices stay lane-dense
    mu_ref[...] = y[:, :o_half].astype(mu_ref.dtype)
    lv_ref[...] = y[:, o_half:].astype(lv_ref.dtype)


# ---------------------------------------------------------------------------
# One-time (per-model) weight preprocessing — hoisted out of the forward.
# ---------------------------------------------------------------------------
def prepare_encoder_params(w1, b1, wmu, bmu, wlv, blv, *, mxu_dtype=None):
    """Weights are stored pre-transposed:
         w1  : [input_dim,  hidden_dim]
         wmu : [hidden_dim, output_dim]
         wlv : [hidden_dim, output_dim]
       biases are [1, features].
       Fuses the mu/logvar heads into one lane-dense slab, zero-pads feature
       dims to multiples of 128 lanes (mathematically inert: zero rows/cols,
       zero bias, ReLU(0)=0), and optionally casts the MXU-fed weights to bf16.
    """
    IN, H = w1.shape
    O = wmu.shape[1]
    H_p = _round_up(H, 128)
    O_p = _round_up(O, 128)

    wdt = mxu_dtype if mxu_dtype is not None else w1.dtype

    # Hidden layer: keep the K dim (input_dim) unpadded — the kernel's x block
    # uses the full array dim there, so no per-call padding of x is needed.
    w1_p = jnp.pad(w1, ((0, 0), (0, H_p - H))).astype(wdt)            # [IN, H_p]
    b1_p = jnp.pad(b1, ((0, 0), (0, H_p - H))).astype(jnp.float32)    # [1, H_p]

    # Fused head: each head padded to O_p, then concatenated -> [H_p, 2*O_p].
    wmu_p = jnp.pad(wmu, ((0, H_p - H), (0, O_p - O)))
    wlv_p = jnp.pad(wlv, ((0, H_p - H), (0, O_p - O)))
    wh_p = jnp.concatenate([wmu_p, wlv_p], axis=1).astype(wdt)        # [H_p, 2*O_p]
    bmu_p = jnp.pad(bmu, ((0, 0), (0, O_p - O)))
    blv_p = jnp.pad(blv, ((0, 0), (0, O_p - O)))
    bh_p = jnp.concatenate([bmu_p, blv_p], axis=1).astype(jnp.float32)  # [1, 2*O_p]

    return dict(
        w1=w1_p, b1=b1_p, wh=wh_p, bh=bh_p,
        input_dim=IN, hidden_dim=H, output_dim=O,
        hidden_pad=H_p, out_pad=O_p,
    )


# ---------------------------------------------------------------------------
# Forward: only the pallas_call per step — no per-call host-side pads/copies.
# ---------------------------------------------------------------------------
def encoder_forward(x, params, *, batch_tile=512,
                    vmem_budget_bytes=60 * 1024 * 1024):
    B, IN = x.shape
    assert IN == params["input_dim"], "input feature dim mismatch"
    w1_p, b1_p = params["w1"], params["b1"]
    wh_p, bh_p = params["wh"], params["bh"]
    H_p, O_p, O = params["hidden_pad"], params["out_pad"], params["output_dim"]
    O2_p = 2 * O_p
    out_dtype = x.dtype
    wdt = w1_p.dtype

    # --- batch-tile selection -----------------------------------------------
    sub = _sublane_multiple(x.dtype)
    wsub = _sublane_multiple(wdt)
    if wsub > sub and B % wsub == 0:      # align to MXU-feed packing when free
        sub = wsub
    TB = min(batch_tile, B)
    # Keep >= 2 batch tiles when the batch allows it, so v7x's two TensorCores
    # both get work from the "parallel" batch axis.
    if B >= 2 * sub and TB >= B:
        TB = pl.cdiv(B, 2)
    TB = _round_up(TB, sub)
    # Full 256-row passes fill the v6e/v7x 256x256 MXU without ragged tails.
    if TB >= 256:
        TB = _round_up(TB, 256)

    # VMEM footprint (conservative: resident weights counted double-buffered).
    def footprint(tb):
        wbytes = jnp.dtype(wdt).itemsize
        xbytes = jnp.dtype(x.dtype).itemsize
        obytes = jnp.dtype(out_dtype).itemsize
        weights = (IN * H_p + H_p * O2_p) * wbytes * 2 + (H_p + O2_p) * 4 * 2
        stream = 2 * tb * IN * xbytes + 2 * 2 * tb * O_p * obytes
        interm = tb * (H_p + O2_p) * 4        # f32 h / y temporaries
        return weights + stream + interm

    while TB > sub and footprint(TB) > vmem_budget_bytes:
        TB = max(_round_up(TB // 2, sub), sub)
    # TODO(synk): if the resident weights alone exceed the VMEM budget, tile the
    # hidden dim with an accumulator scratch instead of keeping them resident.

    grid = (pl.cdiv(B, TB),)

    vmem_limit = int(min(max(footprint(TB) * 5 // 4 + (1 << 20), 16 << 20),
                         128 * 1024 * 1024))

    flops = 2 * B * (IN * H_p + H_p * O2_p)
    bytes_accessed = int(
        x.size * jnp.dtype(x.dtype).itemsize
        + (w1_p.size + wh_p.size) * jnp.dtype(wdt).itemsize
        + (b1_p.size + bh_p.size) * 4
        + 2 * B * O_p * jnp.dtype(out_dtype).itemsize
    )
    cost = pl.CostEstimate(flops=flops, transcendentals=0,
                           bytes_accessed=bytes_accessed)

    def run(single_buffer_weights):
        if single_buffer_weights:
            # Constant index_map -> the block never changes; one buffer is enough.
            resident = lambda shape: pl.BlockSpec(shape, lambda i: (0, 0),
                                                  pipeline_mode=pl.Buffered(1))
        else:
            resident = lambda shape: pl.BlockSpec(shape, lambda i: (0, 0))
        return pl.pallas_call(
            encoder_kernel,
            grid=grid,
            in_specs=[
                pl.BlockSpec((TB, IN), lambda i: (i, 0)),   # x: streamed per tile
                resident((IN, H_p)),                        # w1 (resident)
                resident((1, H_p)),                         # b1
                resident((H_p, O2_p)),                      # fused head weight
                resident((1, O2_p)),                        # fused head bias
            ],
            out_specs=[
                pl.BlockSpec((TB, O_p), lambda i: (i, 0)),  # mu     (lane-dense)
                pl.BlockSpec((TB, O_p), lambda i: (i, 0)),  # logvar (lane-dense)
            ],
            out_shape=[
                jax.ShapeDtypeStruct((B, O_p), out_dtype),
                jax.ShapeDtypeStruct((B, O_p), out_dtype),
            ],
            compiler_params=pltpu.CompilerParams(
                dimension_semantics=("parallel",),   # batch tiles split across TCs
                vmem_limit_bytes=vmem_limit,
            ),
            cost_estimate=cost,
        )(x, w1_p, b1_p, wh_p, bh_p)

    try:
        mu_p, lv_p = run(True)
    except Exception:
        # Fallback for jax builds that reject single-buffered (Buffered(1)) specs.
        mu_p, lv_p = run(False)

    if O_p != O:    # lane slice only when output_dim is not 128-aligned
        mu_p = mu_p[:, :O]
        lv_p = lv_p[:, :O]
    return mu_p, lv_p


def xavier_uniform_t(key, in_features, out_features, gain=0.5, dtype=jnp.float32):
    """Matches nn.init.xavier_uniform_ on a (out, in) weight, returned transposed
    as (in, out) so the kernel computes x @ W^T via a plain row-major matmul."""
    bound = gain * jnp.sqrt(6.0 / (in_features + out_features))
    w = jax.random.uniform(key, (out_features, in_features),
                           minval=-bound, maxval=bound, dtype=dtype)
    return w.T  # (in, out)


if __name__ == "__main__":
    # Small shapes consistent with the module's forward.
    B, INPUT_DIM, HIDDEN_DIM, OUTPUT_DIM = 8, 32, 64, 16

    key = jax.random.PRNGKey(0)
    kx, k1, k2, k3 = jax.random.split(key, 4)

    x = jax.random.normal(kx, (B, INPUT_DIM), dtype=jnp.float32)

    # Deterministic parameter init mirroring weights_init (xavier gain=0.5, bias=0).
    w1 = xavier_uniform_t(k1, INPUT_DIM, HIDDEN_DIM)      # (INPUT_DIM, HIDDEN_DIM)
    b1 = jnp.zeros((1, HIDDEN_DIM), jnp.float32)
    wmu = xavier_uniform_t(k2, HIDDEN_DIM, OUTPUT_DIM)    # (HIDDEN_DIM, OUTPUT_DIM)
    bmu = jnp.zeros((1, OUTPUT_DIM), jnp.float32)
    wlv = xavier_uniform_t(k3, HIDDEN_DIM, OUTPUT_DIM)    # (HIDDEN_DIM, OUTPUT_DIM)
    blv = jnp.zeros((1, OUTPUT_DIM), jnp.float32)

    # Reference in plain JAX (same math as the PyTorch forward).
    h_ref = jnp.maximum(x @ w1 + b1, 0.0)
    mu_ref = h_ref @ wmu + bmu
    lv_ref = h_ref @ wlv + blv

    # --- exact f32 MXU-feed path (bit-comparable to the PyTorch reference) ---
    params_f32 = prepare_encoder_params(w1, b1, wmu, bmu, wlv, blv)
    mu, logvar = encoder_forward(x, params_f32)
    jax.block_until_ready((mu, logvar))
    assert mu.shape == (B, OUTPUT_DIM) and logvar.shape == (B, OUTPUT_DIM)
    assert jnp.allclose(mu, mu_ref, atol=1e-5), "mu mismatch (f32)"
    assert jnp.allclose(logvar, lv_ref, atol=1e-5), "logvar mismatch (f32)"

    # --- bf16 MXU-feed path (v5e/v6e throughput option; looser tolerance because
    #     the hidden activation and weights are deliberately downcast to bf16) ---
    params_bf16 = prepare_encoder_params(w1, b1, wmu, bmu, wlv, blv,
                                         mxu_dtype=jnp.bfloat16)
    mu_b, logvar_b = encoder_forward(x, params_bf16)
    jax.block_until_ready((mu_b, logvar_b))
    assert jnp.allclose(mu_b, mu_ref, atol=3e-2, rtol=3e-2), "mu mismatch (bf16)"
    assert jnp.allclose(logvar_b, lv_ref, atol=3e-2, rtol=3e-2), "logvar mismatch (bf16)"

    print("KERNEL_OK")
</pallas_src>

<mosaic_0001>
module attributes {stable_mosaic.version = 11 : i64} {
  func.func @encoder_kernel(%arg0: i32, %arg1: memref<8x32xf32, #tpu.memory_space<vmem>>, %arg2: memref<32x128xf32, #tpu.memory_space<vmem>>, %arg3: memref<1x128xf32, #tpu.memory_space<vmem>>, %arg4: memref<128x256xf32, #tpu.memory_space<vmem>>, %arg5: memref<1x256xf32, #tpu.memory_space<vmem>>, %arg6: memref<8x128xf32, #tpu.memory_space<vmem>>, %arg7: memref<8x128xf32, #tpu.memory_space<vmem>>) attributes {dimension_semantics = [#tpu.dimension_semantics<parallel>], iteration_bounds = array<i64: 1>, scalar_prefetch = 0 : i64, scratch_operands = 0 : i64, tpu.core_type = #tpu.core_type<tc>, window_params = [{transform_indices = @transform_0, window_bounds = array<i64: 8, 32>}, {pipeline_mode = #tpu.pipeline_mode<synchronous>, transform_indices = @transform_1, window_bounds = array<i64: 32, 128>}, {pipeline_mode = #tpu.pipeline_mode<synchronous>, transform_indices = @transform_2, window_bounds = array<i64: 1, 128>}, {pipeline_mode = #tpu.pipeline_mode<synchronous>, transform_indices = @transform_3, window_bounds = array<i64: 128, 256>}, {pipeline_mode = #tpu.pipeline_mode<synchronous>, transform_indices = @transform_4, window_bounds = array<i64: 1, 256>}, {transform_indices = @transform_5, window_bounds = array<i64: 8, 128>}, {transform_indices = @transform_6, window_bounds = array<i64: 8, 128>}]} {
    %c0 = arith.constant 0 : index
    %c0_0 = arith.constant 0 : index
    %0 = vector.load %arg1[%c0, %c0_0] : memref<8x32xf32, #tpu.memory_space<vmem>>, vector<8x32xf32>
    %c0_1 = arith.constant 0 : index
    %c0_2 = arith.constant 0 : index
    %1 = vector.load %arg2[%c0_1, %c0_2] : memref<32x128xf32, #tpu.memory_space<vmem>>, vector<32x128xf32>
    %cst = arith.constant dense<0.000000e+00> : vector<8x128xf32>
    %2 = tpu.matmul %0, %1, %cst {dimension_numbers = #tpu.dot_dimension_numbers<[1], [0], [0], [1], [0, 0, 1, 1], [], []>} : vector<8x32xf32>, vector<32x128xf32>, vector<8x128xf32> -> vector<8x128xf32>
    %c0_3 = arith.constant 0 : index
    %c0_4 = arith.constant 0 : index
    %3 = vector.load %arg3[%c0_3, %c0_4] : memref<1x128xf32, #tpu.memory_space<vmem>>, vector<1x128xf32>
    %4 = vector.broadcast %3 : vector<1x128xf32> to vector<8x128xf32>
    %5 = arith.addf %2, %4 : vector<8x128xf32>
    %cst_5 = arith.constant 0.000000e+00 : f32
    %6 = vector.broadcast %cst_5 : f32 to vector<8x128xf32>
    %7 = arith.maximumf %5, %6 : vector<8x128xf32>
    %c0_6 = arith.constant 0 : index
    %c0_7 = arith.constant 0 : index
    %8 = vector.load %arg4[%c0_6, %c0_7] : memref<128x256xf32, #tpu.memory_space<vmem>>, vector<128x256xf32>
    %cst_8 = arith.constant dense<0.000000e+00> : vector<8x256xf32>
    %9 = tpu.matmul %7, %8, %cst_8 {dimension_numbers = #tpu.dot_dimension_numbers<[1], [0], [0], [1], [0, 0, 1, 1], [], []>} : vector<8x128xf32>, vector<128x256xf32>, vector<8x256xf32> -> vector<8x256xf32>
    %c0_9 = arith.constant 0 : index
    %c0_10 = arith.constant 0 : index
    %10 = vector.load %arg5[%c0_9, %c0_10] : memref<1x256xf32, #tpu.memory_space<vmem>>, vector<1x256xf32>
    %11 = vector.broadcast %10 : vector<1x256xf32> to vector<8x256xf32>
    %12 = arith.addf %9, %11 : vector<8x256xf32>
    %13 = vector.extract_strided_slice %12 {offsets = [0, 0], sizes = [8, 128], strides = [1, 1]} : vector<8x256xf32> to vector<8x128xf32>
    %c0_11 = arith.constant 0 : index
    %c0_12 = arith.constant 0 : index
    %14 = vector.load %arg6[%c0_11, %c0_12] : memref<8x128xf32, #tpu.memory_space<vmem>>, vector<8x128xf32>
    tpu.vector_store %arg6[%c0_11, %c0_12], %13 {strides = array<i32>} : memref<8x128xf32, #tpu.memory_space<vmem>>, vector<8x128xf32>,
    %15 = vector.extract_strided_slice %12 {offsets = [0, 128], sizes = [8, 128], strides = [1, 1]} : vector<8x256xf32> to vector<8x128xf32>
    %c0_13 = arith.constant 0 : index
    %c0_14 = arith.constant 0 : index
    %16 = vector.load %arg7[%c0_13, %c0_14] : memref<8x128xf32, #tpu.memory_space<vmem>>, vector<8x128xf32>
    tpu.vector_store %arg7[%c0_13, %c0_14], %15 {strides = array<i32>} : memref<8x128xf32, #tpu.memory_space<vmem>>, vector<8x128xf32>,
    return
  }
  func.func @transform_0(%arg0: i32) -> (i32, i32) {
    %c0_i32 = arith.constant 0 : i32
    %c0_i32_0 = arith.constant 0 : i32
    return %arg0, %c0_i32 : i32, i32
  }
  func.func @transform_1(%arg0: i32) -> (i32, i32) {
    %c0_i32 = arith.constant 0 : i32
    %c0_i32_0 = arith.constant 0 : i32
    %c0_i32_1 = arith.constant 0 : i32
    return %c0_i32, %c0_i32_0 : i32, i32
  }
  func.func @transform_2(%arg0: i32) -> (i32, i32) {
    %c0_i32 = arith.constant 0 : i32
    %c0_i32_0 = arith.constant 0 : i32
    %c0_i32_1 = arith.constant 0 : i32
    return %c0_i32, %c0_i32_0 : i32, i32
  }
  func.func @transform_3(%arg0: i32) -> (i32, i32) {
    %c0_i32 = arith.constant 0 : i32
    %c0_i32_0 = arith.constant 0 : i32
    %c0_i32_1 = arith.constant 0 : i32
    return %c0_i32, %c0_i32_0 : i32, i32
  }
  func.func @transform_4(%arg0: i32) -> (i32, i32) {
    %c0_i32 = arith.constant 0 : i32
    %c0_i32_0 = arith.constant 0 : i32
    %c0_i32_1 = arith.constant 0 : i32
    return %c0_i32, %c0_i32_0 : i32, i32
  }
  func.func @transform_5(%arg0: i32) -> (i32, i32) {
    %c0_i32 = arith.constant 0 : i32
    %c0_i32_0 = arith.constant 0 : i32
    return %arg0, %c0_i32 : i32, i32
  }
  func.func @transform_6(%arg0: i32) -> (i32, i32) {
    %c0_i32 = arith.constant 0 : i32
    %c0_i32_0 = arith.constant 0 : i32
    return %arg0, %c0_i32 : i32, i32
  }
}

module attributes {stable_mosaic.version = 11 : i64} {
  func.func @encoder_kernel(%arg0: i32, %arg1: memref<8x32xf32, #tpu.memory_space<vmem>>, %arg2: memref<32x128xf32, #tpu.memory_space<vmem>>, %arg3: memref<1x128xf32, #tpu.memory_space<vmem>>, %arg4: memref<128x256xf32, #tpu.memory_space<vmem>>, %arg5: memref<1x256xf32, #tpu.memory_space<vmem>>, %arg6: memref<8x128xf32, #tpu.memory_space<vmem>>, %arg7: memref<8x128xf32, #tpu.memory_space<vmem>>) attributes {dimension_semantics = [#tpu.dimension_semantics<parallel>], iteration_bounds = array<i64: 1>, scalar_prefetch = 0 : i64, scratch_operands = 0 : i64, tpu.core_type = #tpu.core_type<tc>, window_params = [{transform_indices = @transform_0, window_bounds = array<i64: 8, 32>}, {pipeline_mode = #tpu.pipeline_mode<synchronous>, transform_indices = @transform_1, window_bounds = array<i64: 32, 128>}, {pipeline_mode = #tpu.pipeline_mode<synchronous>, transform_indices = @transform_2, window_bounds = array<i64: 1, 128>}, {pipeline_mode = #tpu.pipeline_mode<synchronous>, transform_indices = @transform_3, window_bounds = array<i64: 128, 256>}, {pipeline_mode = #tpu.pipeline_mode<synchronous>, transform_indices = @transform_4, window_bounds = array<i64: 1, 256>}, {transform_indices = @transform_5, window_bounds = array<i64: 8, 128>}, {transform_indices = @transform_6, window_bounds = array<i64: 8, 128>}]} {
    %c0 = arith.constant 0 : index
    %c0_0 = arith.constant 0 : index
    %0 = vector.load %arg1[%c0, %c0_0] : memref<8x32xf32, #tpu.memory_space<vmem>>, vector<8x32xf32>
    %c0_1 = arith.constant 0 : index
    %c0_2 = arith.constant 0 : index
    %1 = vector.load %arg2[%c0_1, %c0_2] : memref<32x128xf32, #tpu.memory_space<vmem>>, vector<32x128xf32>
    %cst = arith.constant dense<0.000000e+00> : vector<8x128xf32>
    %2 = tpu.matmul %0, %1, %cst {dimension_numbers = #tpu.dot_dimension_numbers<[1], [0], [0], [1], [0, 0, 1, 1], [], []>} : vector<8x32xf32>, vector<32x128xf32>, vector<8x128xf32> -> vector<8x128xf32>
    %c0_3 = arith.constant 0 : index
    %c0_4 = arith.constant 0 : index
    %3 = vector.load %arg3[%c0_3, %c0_4] : memref<1x128xf32, #tpu.memory_space<vmem>>, vector<1x128xf32>
    %4 = vector.broadcast %3 : vector<1x128xf32> to vector<8x128xf32>
    %5 = arith.addf %2, %4 : vector<8x128xf32>
    %cst_5 = arith.constant 0.000000e+00 : f32
    %6 = vector.broadcast %cst_5 : f32 to vector<8x128xf32>
    %7 = arith.maximumf %5, %6 : vector<8x128xf32>
    %c0_6 = arith.constant 0 : index
    %c0_7 = arith.constant 0 : index
    %8 = vector.load %arg4[%c0_6, %c0_7] : memref<128x256xf32, #tpu.memory_space<vmem>>, vector<128x256xf32>
    %cst_8 = arith.constant dense<0.000000e+00> : vector<8x256xf32>
    %9 = tpu.matmul %7, %8, %cst_8 {dimension_numbers = #tpu.dot_dimension_numbers<[1], [0], [0], [1], [0, 0, 1, 1], [], []>} : vector<8x128xf32>, vector<128x256xf32>, vector<8x256xf32> -> vector<8x256xf32>
    %c0_9 = arith.constant 0 : index
    %c0_10 = arith.constant 0 : index
    %10 = vector.load %arg5[%c0_9, %c0_10] : memref<1x256xf32, #tpu.memory_space<vmem>>, vector<1x256xf32>
    %11 = vector.broadcast %10 : vector<1x256xf32> to vector<8x256xf32>
    %12 = arith.addf %9, %11 : vector<8x256xf32>
    %13 = vector.extract_strided_slice %12 {offsets = [0, 0], sizes = [8, 128], strides = [1, 1]} : vector<8x256xf32> to vector<8x128xf32>
    %c0_11 = arith.constant 0 : index
    %c0_12 = arith.constant 0 : index
    %14 = vector.load %arg6[%c0_11, %c0_12] : memref<8x128xf32, #tpu.memory_space<vmem>>, vector<8x128xf32>
    tpu.vector_store %arg6[%c0_11, %c0_12], %13 {strides = array<i32>} : memref<8x128xf32, #tpu.memory_space<vmem>>, vector<8x128xf32>,
    %15 = vector.extract_strided_slice %12 {offsets = [0, 128], sizes = [8, 128], strides = [1, 1]} : vector<8x256xf32> to vector<8x128xf32>
    %c0_13 = arith.constant 0 : index
    %c0_14 = arith.constant 0 : index
    %16 = vector.load %arg7[%c0_13, %c0_14] : memref<8x128xf32, #tpu.memory_space<vmem>>, vector<8x128xf32>
    tpu.vector_store %arg7[%c0_13, %c0_14], %15 {strides = array<i32>} : memref<8x128xf32, #tpu.memory_space<vmem>>, vector<8x128xf32>,
    return
  }
  func.func @transform_0(%arg0: i32) -> (i32, i32) {
    %c0_i32 = arith.constant 0 : i32
    %c0_i32_0 = arith.constant 0 : i32
    return %arg0, %c0_i32 : i32, i32
  }
  func.func @transform_1(%arg0: i32) -> (i32, i32) {
    %c0_i32 = arith.constant 0 : i32
    %c0_i32_0 = arith.constant 0 : i32
    %c0_i32_1 = arith.constant 0 : i32
    return %c0_i32, %c0_i32_0 : i32, i32
  }
  func.func @transform_2(%arg0: i32) -> (i32, i32) {
    %c0_i32 = arith.constant 0 : i32
    %c0_i32_0 = arith.constant 0 : i32
    %c0_i32_1 = arith.constant 0 : i32
    return %c0_i32, %c0_i32_0 : i32, i32
  }
  func.func @transform_3(%arg0: i32) -> (i32, i32) {
    %c0_i32 = arith.constant 0 : i32
    %c0_i32_0 = arith.constant 0 : i32
    %c0_i32_1 = arith.constant 0 : i32
    return %c0_i32, %c0_i32_0 : i32, i32
  }
  func.func @transform_4(%arg0: i32) -> (i32, i32) {
    %c0_i32 = arith.constant 0 : i32
    %c0_i32_0 = arith.constant 0 : i32
    %c0_i32_1 = arith.constant 0 : i32
    return %c0_i32, %c0_i32_0 : i32, i32
  }
  func.func @transform_5(%arg0: i32) -> (i32, i32) {
    %c0_i32 = arith.constant 0 : i32
    %c0_i32_0 = arith.constant 0 : i32
    return %arg0, %c0_i32 : i32, i32
  }
  func.func @transform_6(%arg0: i32) -> (i32, i32) {
    %c0_i32 = arith.constant 0 : i32
    %c0_i32_0 = arith.constant 0 : i32
    return %arg0, %c0_i32 : i32, i32
  }
}

</mosaic_0001>

<bundles_post_ra>
// kernel: tpu_custom_call.1
= control target key start
LH: loop header
LB: loop body
LE: loop exit
PB: predicated region body
PF: predicated region fallthrough
CT: control target
= control target key end

     0   :  { %12 = vsyncpa [#allocation3], 0  ;;  %s596_s0 = inlined_call_operand.hbm [shape: f32[8,32], index: 0, kind: input, shape index: {}]   ;;  %s597_s1 = inlined_call_operand.hbm [shape: f32[32,128], index: 1, kind: input, shape index: {}]   ;;  %s598_s2 = inlined_call_operand.vmem [shape: f32[1,128], index: 2, kind: input, shape index: {}]   ;;  %s599_s3 = inlined_call_operand.hbm [shape: f32[128,256], index: 3, kind: input, shape index: {}]   ;;  %s600_s4 = inlined_call_operand.vmem [shape: f32[1,256], index: 4, kind: input, shape index: {}]   ;;  %s601_s5 = inlined_call_operand.hbm [shape: f32[8,128], index: 5, kind: output, shape index: {0}]   ;;  %s602_s6 = inlined_call_operand.hbm [shape: f32[8,128], index: 6, kind: output, shape index: {1}]  }
   0x1   :  { %13 = vsyncpa [#allocation6], 0 }
   0x2   :  { %14 = vsyncpa [#allocation4], 0 }
   0x3   :  { %15 = vsyncpa [#allocation10], 0  ;;  %s483_s21 = smov [#allocation5]   ;;  %s365_s25 = scalar_lea.hbm %s597_s1, 512 }
   0x4   :  { %s31_s22 = sshll.u32 %s483_s21, 4  ;;  %p366_p0 = scmp.ne.s32.totalorder %s597_s1, %s365_s25  ;;  %s32_s22 = int_to_ptr.vmem [resolvable:$true] %s31_s22 }
   0x5   :  { %p369_p1 = scmp.lt.u32.totalorder %s365_s25, %s597_s1 }
   0x7   :  { %p371_p2 = pnand %p369_p1, %p366_p0 }
   0x9   :  { %374 = shalt.err (!%p371_p2)
}
   0xa   :  { %s375_s30 = scalar_lea.vmem %s32_s22, 512  ;;  %p380_p4 = scmp.lt.s32.totalorder %s32_s22, %s32_s22 }
   0xb   :  { %p376_p3 = scmp.ne.s32.totalorder %s32_s22, %s375_s30  ;;  %p381_p5 = scmp.lt.s32.totalorder %s375_s30, %s375_s30 }
   0xd   :  { %p382_p6 = por %p381_p5, %p380_p4 }
   0xf   :  { %p383_p7 = pnand %p382_p6, %p376_p3 }
  0x11   :  { %386 = shalt.err (!%p383_p7)
}
  0x12   :  { %s484_s7 = smov 128   ;;  %s485_s8 = smov 8  }
  0x13   :  { %37 = dma.hbm_to_vmem [thread:$0]  %s597_s1, 512, %s32_s22, [#allocation6], %s484_s7, %s484_s7, %s485_s8  }
  0x14   :  { %s486_s11 = smov [#allocation2]   ;;  %s487_s13 = smov [#allocation7]  }
  0x15   :  { %s22_s12 = sshll.u32 %s486_s11, 4  ;;  %s45_s14 = sshll.u32 %s487_s13, 4  ;;  %s23_s12 = int_to_ptr.vmem [resolvable:$true] %s22_s12  ;;  %s46_s14 = int_to_ptr.vmem [resolvable:$true] %s45_s14 }
  0x16   :  { %s387_s17 = scalar_lea.hbm %s596_s0, 128 }
  0x17   :  { %p388_p8 = scmp.ne.s32.totalorder %s596_s0, %s387_s17  ;;  %p391_p9 = scmp.lt.u32.totalorder %s387_s17, %s596_s0 }
  0x19   :  { %p393_p10 = pnand %p391_p9, %p388_p8 }
  0x1b   :  { %396 = shalt.err (!%p393_p10)
}
  0x1c   :  { %s397_s1 = scalar_lea.vmem %s23_s12, 128  ;;  %p402_p12 = scmp.lt.s32.totalorder %s23_s12, %s23_s12 }
  0x1d   :  { %p398_p11 = scmp.ne.s32.totalorder %s23_s12, %s397_s1  ;;  %p403_p13 = scmp.lt.s32.totalorder %s397_s1, %s397_s1 }
  0x1f   :  { %p404_p0 = por %p403_p13, %p402_p12 }
  0x21   :  { %p405_p1 = pnand %p404_p0, %p398_p11 }
  0x23   :  { %408 = shalt.err (!%p405_p1)
}
  0x24   :  { %25 = dma.hbm_to_vmem [thread:$0]  %s596_s0, 128, %s23_s12, [#allocation3]  }
  0x25   :  { %s409_s26 = scalar_lea.hbm %s599_s3, 4096 }
  0x26   :  { %p410_p2 = scmp.ne.s32.totalorder %s599_s3, %s409_s26  ;;  %p413_p3 = scmp.lt.u32.totalorder %s409_s26, %s599_s3 }
  0x28   :  { %p415_p4 = pnand %p413_p3, %p410_p2 }
  0x2a   :  { %418 = shalt.err (!%p415_p4)
}
  0x2b   :  { %s419_s7 = scalar_lea.vmem %s46_s14, 4096  ;;  %p424_p6 = scmp.lt.s32.totalorder %s46_s14, %s46_s14 }
  0x2c   :  { %p420_p5 = scmp.ne.s32.totalorder %s46_s14, %s419_s7  ;;  %p425_p7 = scmp.lt.s32.totalorder %s419_s7, %s419_s7 }
  0x2e   :  { %p426_p8 = por %p425_p7, %p424_p6 }
  0x30   :  { %p427_p9 = pnand %p426_p8, %p420_p5 }
  0x32   :  { %430 = shalt.err (!%p427_p9)
}
  0x33   :  { %s488_s0 = smov 256   ;;  %s489_s8 = smov 16  }
  0x34   :  { %51 = dma.hbm_to_vmem [thread:$0]  %s599_s3, 4096, %s46_s14, [#allocation6], %s488_s0, %s488_s0, %s489_s8  }
  0x35   :  { %475 = dma.done.wait [#allocation3], 128  }
  0x36   :  { %476 = vsyncadd [#allocation3], 4294967168 }
  0x37   :  { %477 = dma.done.wait [#allocation6], 4608  }
  0x38   :  { %478 = vsyncadd [#allocation6], 4294962688  ;;  %v490_v0 = vmov 0.0|0.0   ;;  %vm491_vm0 = vmmov 0   ;;  %v492_v1 = vmov 0.0   ;;  %v64_v2 = vld [vmem:[#allocation5] sm:$0xff]  ;;  %v184_v62 = vlaneseq }
  0x39   :  { %315 = vmatprep.subr.bf16.mxu0 %v490_v0  ;;  %312 = vmatprep.mubr.msk.f32.mxu0 %vm491_vm0, %v492_v1  ;;  %v65_v3 = vld [vmem:[#allocation5 + $0x8] sm:$0xff]  ;;  %v66_v4 = vld [vmem:[#allocation5 + $0x10] sm:$0xff]  ;;  %v67_v6 = vld [vmem:[#allocation5 + $0x18] sm:$0xff]  ;;  %vm75_vm1 = vcmask 261120   ;;  %s493_s14 = smov [#allocation8]   ;;  %s494_s16 = smov [#allocation9]  }
  0x3a   :  { %258 = vmatprep.mubr.f32.mxu1 %v492_v1  ;;  %v316_v5 = vpack.c.bf16 %v65_v3, %v64_v2  ;;  %v151_v7 = vld [vmem:[#allocation7 + $0x8] sm:$0xff]  ;;  %v153_v8 = vld [vmem:[#allocation7 + $0x18] sm:$0xff]  ;;  %v150_v9 = vld [vmem:[#allocation7] sm:$0xff]  ;;  %v319_v11 = vpack.c.bf16 %v67_v6, %v66_v4  ;;  %v185_v63 = vshrl.u32 %v184_v62, 7  ;;  %s273_s15 = sshll.u32 %s493_s14, 4  ;;  %s283_s17 = sshll.u32 %s494_s16, 4  ;;  %s274_s15 = int_to_ptr.vmem [resolvable:$true] %s273_s15  ;;  %s284_s17 = int_to_ptr.vmem [resolvable:$true] %s283_s17 }
  0x3b   :  { %v152_v10 = vld [vmem:[#allocation7 + $0x10] sm:$0xff]  ;;  %v321_v12 = vpack.c.bf16 %v153_v8, %v151_v7  ;;  %v155_v14 = vld [vmem:[#allocation7 + $0x28] sm:$0xff]  ;;  %v157_v15 = vld [vmem:[#allocation7 + $0x38] sm:$0xff]  ;;  %p436_p11 = scmp.lt.s32.totalorder %s274_s15, %s274_s15 }
  0x3c   :  { %317 = vmatpush3.bf16.msra.mxu0 %v316_v5  ;;  %v323_v13 = vpack.c.bf16 %v152_v10, %v150_v9  ;;  %v154_v16 = vld [vmem:[#allocation7 + $0x20] sm:$0xff]  ;;  %v325_v17 = vpack.c.bf16 %v157_v15, %v155_v14  ;;  %v156_v18 = vld [vmem:[#allocation7 + $0x30] sm:$0xff]  ;;  %v159_v19 = vld [vmem:[#allocation7 + $0x48] sm:$0xff]  ;;  %v190_v2 = vsub.s32 1, %v185_v63 }
  0x3d   :  { %318 = vmatprep.subr.bf16.mxu0 %v490_v0  ;;  %v161_v20 = vld [vmem:[#allocation7 + $0x58] sm:$0xff]  ;;  %322 = vmatprep.subr.bf16.mxu1 %v321_v12  ;;  %v327_v21 = vpack.c.bf16 %v156_v18, %v154_v16  ;;  %v158_v24 = vld [vmem:[#allocation7 + $0x40] sm:$0xff]  ;;  %v160_v25 = vld [vmem:[#allocation7 + $0x50] sm:$0xff]  ;;  %v186_v0 = vsub.s32 0, %v185_v63 }
  0x3e   :  { %324 = vmatpush1.bf16.msra.mxu1 %v323_v13  ;;  %v63_v22 = vld [vmem:[#allocation2] sm:$0xff]  ;;  %v329_v23 = vpack.c.bf16 %v161_v20, %v159_v19  ;;  %v163_v26 = vld [vmem:[#allocation7 + $0x68] sm:$0xff]  ;;  %v331_v28 = vpack.c.bf16 %v160_v25, %v158_v24  ;;  %v162_v30 = vld [vmem:[#allocation7 + $0x60] sm:$0xff] }
  0x3f   :  { %326 = vmatprep.subr.bf16.mxu1 %v325_v17  ;;  %v165_v27 = vld [vmem:[#allocation7 + $0x78] sm:$0xff]  ;;  %v164_v31 = vld [vmem:[#allocation7 + $0x70] sm:$0xff]  ;;  %v167_v32 = vld [vmem:[#allocation7 + $0x88] sm:$0xff] }
  0x40   :  { %320 = vmatpush3.bf16.msra.mxu0 %v319_v11  ;;  %v333_v29 = vpack.c.bf16 %v165_v27, %v163_v26  ;;  %v169_v33 = vld [vmem:[#allocation7 + $0x98] sm:$0xff]  ;;  %v335_v34 = vpack.c.bf16 %v164_v31, %v162_v30  ;;  %v166_v36 = vld [vmem:[#allocation7 + $0x80] sm:$0xff]  ;;  %v168_v37 = vld [vmem:[#allocation7 + $0x90] sm:$0xff] }
  0x41   :  { %v337_v35 = vpack.c.bf16 %v169_v33, %v167_v32  ;;  %v171_v38 = vld [vmem:[#allocation7 + $0xa8] sm:$0xff]  ;;  %v173_v39 = vld [vmem:[#allocation7 + $0xb8] sm:$0xff]  ;;  %v339_v40 = vpack.c.bf16 %v168_v37, %v166_v36  ;;  %v170_v42 = vld [vmem:[#allocation7 + $0xa0] sm:$0xff] }
  0x42   :  { %328 = vmatpush1.bf16.msra.mxu1 %v327_v21  ;;  %v341_v41 = vpack.c.bf16 %v173_v39, %v171_v38  ;;  %v172_v43 = vld [vmem:[#allocation7 + $0xb0] sm:$0xff]  ;;  %v175_v44 = vld [vmem:[#allocation7 + $0xc8] sm:$0xff]  ;;  %v177_v45 = vld [vmem:[#allocation7 + $0xd8] sm:$0xff] }
  0x43   :  { %313 = vmatmul.mubr.msk.f32.vlgmr.msra.gmra.mrb[0].mxu0 %vm75_vm1, %v63_v22  ;;  %330 = vmatprep.subr.bf16.mxu1 %v329_v23  ;;  %v343_v46 = vpack.c.bf16 %v172_v43, %v170_v42  ;;  %v345_v47 = vpack.c.bf16 %v177_v45, %v175_v44  ;;  %v174_v48 = vld [vmem:[#allocation7 + $0xc0] sm:$0xff]  ;;  %v176_v49 = vld [vmem:[#allocation7 + $0xd0] sm:$0xff]  ;;  %v179_v51 = vld [vmem:[#allocation7 + $0xe8] sm:$0xff] }
  0x44   :  { %v347_v50 = vpack.c.bf16 %v176_v49, %v174_v48  ;;  %v181_v52 = vld [vmem:[#allocation7 + $0xf8] sm:$0xff]  ;;  %v178_v54 = vld [vmem:[#allocation7 + $0xe0] sm:$0xff]  ;;  %v180_v55 = vld [vmem:[#allocation7 + $0xf0] sm:$0xff] }
  0x45   :  { %v349_v53 = vpack.c.bf16 %v181_v52, %v179_v51  ;;  %v351_v56 = vpack.c.bf16 %v180_v55, %v178_v54  ;;  %v297_v57 = vld [vmem:[%s598_s2] ss:$0 sm:$0xff]  ;;  %s431_s2 = scalar_lea.vmem %s274_s15, 128 }
  0x46   :  { %332 = vmatpush1.bf16.msra.mxu1 %v331_v28  ;;  %v182_v1 = vld [vmem:[%s600_s4] sm:$0x3]  ;;  %p432_p10 = scmp.ne.s32.totalorder %s274_s15, %s431_s2  ;;  %p437_p12 = scmp.lt.s32.totalorder %s431_s2, %s431_s2 }
  0x47   :  { %334 = vmatprep.subr.bf16.mxu1 %v333_v29  ;;  %v187_v3 = vrot.slane %v182_v1, %v186_v0  ;;  %v191_v4 = vrot.slane %v182_v1, %v190_v2 }
  0x48   :  { %p438_p13 = por %p437_p12, %p436_p11 }
  0x4a   :  { %336 = vmatpush1.bf16.msra.mxu1 %v335_v34  ;;  %p439_p0 = pnand %p438_p13, %p432_p10 }
  0x4b   :  { %338 = vmatprep.subr.bf16.mxu1 %v337_v35 }
  0x4e   :  { %340 = vmatpush1.bf16.msra.mxu1 %v339_v40 }
  0x4f   :  { %342 = vmatprep.subr.bf16.mxu1 %v341_v41 }
  0x52   :  { %344 = vmatpush1.bf16.msra.mxu1 %v343_v46 }
  0x53   :  { %346 = vmatprep.subr.bf16.mxu1 %v345_v47 }
  0x56   :  { %348 = vmatpush1.bf16.msra.mxu1 %v347_v50 }
  0x57   :  { %350 = vmatprep.subr.bf16.mxu1 %v349_v53 }
  0x5a   :  { %352 = vmatpush1.bf16.msra.mxu1 %v351_v56 }
 0x116   :  { %v145_v58 = vpop.f32.mrb[0].mxu0 }
 0x117   :  { %v146_v59 = vadd.f32 %v297_v57, %v145_v58  ;;  %v314_v60 = vpop.f32.mrb[1].mxu0 }
 0x119   :  { %v149_v61 = vmax.f32 %v146_v59, 0.0 }
 0x11b   :  { %259 = vmatmul.mubr.f32.vlgmr.msra.gmra.mrb[0].mxu1 %v149_v61 }
 0x1ee   :  { %v260_v5 = vpop.f32.mrb[0].mxu1 }
 0x1ef   :  { %v261_v6 = vadd.f32 %v260_v5, %v187_v3  ;;  %v262_v7 = vpop.f32.mrb[1].mxu1 }
 0x1f0   :  { %v263_v8 = vadd.f32 %v262_v7, %v191_v4 }
 0x1f1   :  { %265 = vst [vmem:[#allocation8] sm:$0xff] %v261_v6 }
 0x1f2   :  { %266 = vst [vmem:[#allocation9] sm:$0xff] %v263_v8 }
 0x1f3   :  { %442 = shalt.err (!%p439_p0)
}
 0x1f4   :  { %s443_s19 = scalar_lea.hbm %s601_s5, 128 }
 0x1f5   :  { %p444_p1 = scmp.ne.s32.totalorder %s601_s5, %s443_s19  ;;  %p447_p2 = scmp.lt.u32.totalorder %s443_s19, %s601_s5 }
 0x1f7   :  { %p449_p3 = pnand %p447_p2, %p444_p1 }
 0x1f9   :  { %452 = shalt.err (!%p449_p3)
}
 0x1fa   :  { %276 = dma.vmem_to_hbm [thread:$0]  %s274_s15, 128, %s601_s5, [#allocation4]  }
 0x1fb   :  { %s453_s25 = scalar_lea.vmem %s284_s17, 128  ;;  %p458_p5 = scmp.lt.s32.totalorder %s284_s17, %s284_s17 }
 0x1fc   :  { %p454_p4 = scmp.ne.s32.totalorder %s284_s17, %s453_s25  ;;  %p459_p6 = scmp.lt.s32.totalorder %s453_s25, %s453_s25 }
 0x1fe   :  { %p460_p7 = por %p459_p6, %p458_p5 }
 0x200   :  { %p461_p8 = pnand %p460_p7, %p454_p4 }
 0x202   :  { %464 = shalt.err (!%p461_p8)
}
 0x203   :  { %s465_s28 = scalar_lea.hbm %s602_s6, 128 }
 0x204   :  { %p466_p9 = scmp.ne.s32.totalorder %s602_s6, %s465_s28  ;;  %p469_p10 = scmp.lt.u32.totalorder %s465_s28, %s602_s6 }
 0x206   :  { %p471_p11 = pnand %p469_p10, %p466_p9 }
 0x208   :  { %474 = shalt.err (!%p471_p11)
}
 0x209   :  { %286 = dma.vmem_to_hbm [thread:$0]  %s284_s17, 128, %s602_s6, [#allocation10]  }
 0x20a   :  { %479 = dma.done.wait [#allocation4], 128  }
 0x20b   :  { %480 = vsyncadd [#allocation4], 4294967168 }
 0x20c   :  { %481 = dma.done.wait [#allocation10], 128  }
 0x20d   :  { %482 = vsyncadd [#allocation10], 4294967168 }
 0x20e   :  { %293 = vsyncpa [#allocation3], 1 }
 0x20f   :  { %294 = vsyncpa [#allocation6], 1 }
 0x210   :  { %295 = vsyncpa [#allocation4], 1 }
 0x211   :  { %296 = vsyncpa [#allocation10], 1 }

// kernel: tpu_custom_call.1
= control target key start
LH: loop header
LB: loop body
LE: loop exit
PB: predicated region body
PF: predicated region fallthrough
CT: control target
= control target key end

     0   :  { %12 = vsyncpa [#allocation3], 0  ;;  %s596_s0 = inlined_call_operand.hbm [shape: f32[8,32], index: 0, kind: input, shape index: {}]   ;;  %s597_s1 = inlined_call_operand.hbm [shape: f32[32,128], index: 1, kind: input, shape index: {}]   ;;  %s598_s2 = inlined_call_operand.vmem [shape: f32[1,128], index: 2, kind: input, shape index: {}]   ;;  %s599_s3 = inlined_call_operand.hbm [shape: f32[128,256], index: 3, kind: input, shape index: {}]   ;;  %s600_s4 = inlined_call_operand.vmem [shape: f32[1,256], index: 4, kind: input, shape index: {}]   ;;  %s601_s5 = inlined_call_operand.hbm [shape: f32[8,128], index: 5, kind: output, shape index: {0}]   ;;  %s602_s6 = inlined_call_operand.hbm [shape: f32[8,128], index: 6, kind: output, shape index: {1}]  }
   0x1   :  { %13 = vsyncpa [#allocation6], 0 }
   0x2   :  { %14 = vsyncpa [#allocation4], 0 }
   0x3   :  { %15 = vsyncpa [#allocation10], 0  ;;  %s483_s21 = smov [#allocation5]   ;;  %s365_s25 = scalar_lea.hbm %s597_s1, 512 }
   0x4   :  { %s31_s22 = sshll.u32 %s483_s21, 4  ;;  %p366_p0 = scmp.ne.s32.totalorder %s597_s1, %s365_s25  ;;  %s32_s22 = int_to_ptr.vmem [resolvable:$true] %s31_s22 }
   0x5   :  { %p369_p1 = scmp.lt.u32.totalorder %s365_s25, %s597_s1 }
   0x7   :  { %p371_p2 = pnand %p369_p1, %p366_p0 }
   0x9   :  { %374 = shalt.err (!%p371_p2)
}
   0xa   :  { %s375_s30 = scalar_lea.vmem %s32_s22, 512  ;;  %p380_p4 = scmp.lt.s32.totalorder %s32_s22, %s32_s22 }
   0xb   :  { %p376_p3 = scmp.ne.s32.totalorder %s32_s22, %s375_s30  ;;  %p381_p5 = scmp.lt.s32.totalorder %s375_s30, %s375_s30 }
   0xd   :  { %p382_p6 = por %p381_p5, %p380_p4 }
   0xf   :  { %p383_p7 = pnand %p382_p6, %p376_p3 }
  0x11   :  { %386 = shalt.err (!%p383_p7)
}
  0x12   :  { %s484_s7 = smov 128   ;;  %s485_s8 = smov 8  }
  0x13   :  { %37 = dma.hbm_to_vmem [thread:$0]  %s597_s1, 512, %s32_s22, [#allocation6], %s484_s7, %s484_s7, %s485_s8  }
  0x14   :  { %s486_s11 = smov [#allocation2]   ;;  %s487_s13 = smov [#allocation7]  }
  0x15   :  { %s22_s12 = sshll.u32 %s486_s11, 4  ;;  %s45_s14 = sshll.u32 %s487_s13, 4  ;;  %s23_s12 = int_to_ptr.vmem [resolvable:$true] %s22_s12  ;;  %s46_s14 = int_to_ptr.vmem [resolvable:$true] %s45_s14 }
  0x16   :  { %s387_s17 = scalar_lea.hbm %s596_s0, 128 }
  0x17   :  { %p388_p8 = scmp.ne.s32.totalorder %s596_s0, %s387_s17  ;;  %p391_p9 = scmp.lt.u32.totalorder %s387_s17, %s596_s0 }
  0x19   :  { %p393_p10 = pnand %p391_p9, %p388_p8 }
  0x1b   :  { %396 = shalt.err (!%p393_p10)
}
  0x1c   :  { %s397_s1 = scalar_lea.vmem %s23_s12, 128  ;;  %p402_p12 = scmp.lt.s32.totalorder %s23_s12, %s23_s12 }
  0x1d   :  { %p398_p11 = scmp.ne.s32.totalorder %s23_s12, %s397_s1  ;;  %p403_p13 = scmp.lt.s32.totalorder %s397_s1, %s397_s1 }
  0x1f   :  { %p404_p0 = por %p403_p13, %p402_p12 }
  0x21   :  { %p405_p1 = pnand %p404_p0, %p398_p11 }
  0x23   :  { %408 = shalt.err (!%p405_p1)
}
  0x24   :  { %25 = dma.hbm_to_vmem [thread:$0]  %s596_s0, 128, %s23_s12, [#allocation3]  }
  0x25   :  { %s409_s26 = scalar_lea.hbm %s599_s3, 4096 }
  0x26   :  { %p410_p2 = scmp.ne.s32.totalorder %s599_s3, %s409_s26  ;;  %p413_p3 = scmp.lt.u32.totalorder %s409_s26, %s599_s3 }
  0x28   :  { %p415_p4 = pnand %p413_p3, %p410_p2 }
  0x2a   :  { %418 = shalt.err (!%p415_p4)
}
  0x2b   :  { %s419_s7 = scalar_lea.vmem %s46_s14, 4096  ;;  %p424_p6 = scmp.lt.s32.totalorder %s46_s14, %s46_s14 }
  0x2c   :  { %p420_p5 = scmp.ne.s32.totalorder %s46_s14, %s419_s7  ;;  %p425_p7 = scmp.lt.s32.totalorder %s419_s7, %s419_s7 }
  0x2e   :  { %p426_p8 = por %p425_p7, %p424_p6 }
  0x30   :  { %p427_p9 = pnand %p426_p8, %p420_p5 }
  0x32   :  { %430 = shalt.err (!%p427_p9)
}
  0x33   :  { %s488_s0 = smov 256   ;;  %s489_s8 = smov 16  }
  0x34   :  { %51 = dma.hbm_to_vmem [thread:$0]  %s599_s3, 4096, %s46_s14, [#allocation6], %s488_s0, %s488_s0, %s489_s8  }
  0x35   :  { %475 = dma.done.wait [#allocation3], 128  }
  0x36   :  { %476 = vsyncadd [#allocation3], 4294967168 }
  0x37   :  { %477 = dma.done.wait [#allocation6], 4608  }
  0x38   :  { %478 = vsyncadd [#allocation6], 4294962688  ;;  %v490_v0 = vmov 0.0|0.0   ;;  %vm491_vm0 = vmmov 0   ;;  %v492_v1 = vmov 0.0   ;;  %v64_v2 = vld [vmem:[#allocation5] sm:$0xff]  ;;  %v184_v62 = vlaneseq }
  0x39   :  { %315 = vmatprep.subr.bf16.mxu0 %v490_v0  ;;  %312 = vmatprep.mubr.msk.f32.mxu0 %vm491_vm0, %v492_v1  ;;  %v65_v3 = vld [vmem:[#allocation5 + $0x8] sm:$0xff]  ;;  %v66_v4 = vld [vmem:[#allocation5 + $0x10] sm:$0xff]  ;;  %v67_v6 = vld [vmem:[#allocation5 + $0x18] sm:$0xff]  ;;  %vm75_vm1 = vcmask 261120   ;;  %s493_s14 = smov [#allocation8]   ;;  %s494_s16 = smov [#allocation9]  }
  0x3a   :  { %258 = vmatprep.mubr.f32.mxu1 %v492_v1  ;;  %v316_v5 = vpack.c.bf16 %v65_v3, %v64_v2  ;;  %v151_v7 = vld [vmem:[#allocation7 + $0x8] sm:$0xff]  ;;  %v153_v8 = vld [vmem:[#allocation7 + $0x18] sm:$0xff]  ;;  %v150_v9 = vld [vmem:[#allocation7] sm:$0xff]  ;;  %v319_v11 = vpack.c.bf16 %v67_v6, %v66_v4  ;;  %v185_v63 = vshrl.u32 %v184_v62, 7  ;;  %s273_s15 = sshll.u32 %s493_s14, 4  ;;  %s283_s17 = sshll.u32 %s494_s16, 4  ;;  %s274_s15 = int_to_ptr.vmem [resolvable:$true] %s273_s15  ;;  %s284_s17 = int_to_ptr.vmem [resolvable:$true] %s283_s17 }
  0x3b   :  { %v152_v10 = vld [vmem:[#allocation7 + $0x10] sm:$0xff]  ;;  %v321_v12 = vpack.c.bf16 %v153_v8, %v151_v7  ;;  %v155_v14 = vld [vmem:[#allocation7 + $0x28] sm:$0xff]  ;;  %v157_v15 = vld [vmem:[#allocation7 + $0x38] sm:$0xff]  ;;  %p436_p11 = scmp.lt.s32.totalorder %s274_s15, %s274_s15 }
  0x3c   :  { %317 = vmatpush3.bf16.msra.mxu0 %v316_v5  ;;  %v323_v13 = vpack.c.bf16 %v152_v10, %v150_v9  ;;  %v154_v16 = vld [vmem:[#allocation7 + $0x20] sm:$0xff]  ;;  %v325_v17 = vpack.c.bf16 %v157_v15, %v155_v14  ;;  %v156_v18 = vld [vmem:[#allocation7 + $0x30] sm:$0xff]  ;;  %v159_v19 = vld [vmem:[#allocation7 + $0x48] sm:$0xff]  ;;  %v190_v2 = vsub.s32 1, %v185_v63 }
  0x3d   :  { %318 = vmatprep.subr.bf16.mxu0 %v490_v0  ;;  %v161_v20 = vld [vmem:[#allocation7 + $0x58] sm:$0xff]  ;;  %322 = vmatprep.subr.bf16.mxu1 %v321_v12  ;;  %v327_v21 = vpack.c.bf16 %v156_v18, %v154_v16  ;;  %v158_v24 = vld [vmem:[#allocation7 + $0x40] sm:$0xff]  ;;  %v160_v25 = vld [vmem:[#allocation7 + $0x50] sm:$0xff]  ;;  %v186_v0 = vsub.s32 0, %v185_v63 }
  0x3e   :  { %324 = vmatpush1.bf16.msra.mxu1 %v323_v13  ;;  %v63_v22 = vld [vmem:[#allocation2] sm:$0xff]  ;;  %v329_v23 = vpack.c.bf16 %v161_v20, %v159_v19  ;;  %v163_v26 = vld [vmem:[#allocation7 + $0x68] sm:$0xff]  ;;  %v331_v28 = vpack.c.bf16 %v160_v25, %v158_v24  ;;  %v162_v30 = vld [vmem:[#allocation7 + $0x60] sm:$0xff] }
  0x3f   :  { %326 = vmatprep.subr.bf16.mxu1 %v325_v17  ;;  %v165_v27 = vld [vmem:[#allocation7 + $0x78] sm:$0xff]  ;;  %v164_v31 = vld [vmem:[#allocation7 + $0x70] sm:$0xff]  ;;  %v167_v32 = vld [vmem:[#allocation7 + $0x88] sm:$0xff] }
  0x40   :  { %320 = vmatpush3.bf16.msra.mxu0 %v319_v11  ;;  %v333_v29 = vpack.c.bf16 %v165_v27, %v163_v26  ;;  %v169_v33 = vld [vmem:[#allocation7 + $0x98] sm:$0xff]  ;;  %v335_v34 = vpack.c.bf16 %v164_v31, %v162_v30  ;;  %v166_v36 = vld [vmem:[#allocation7 + $0x80] sm:$0xff]  ;;  %v168_v37 = vld [vmem:[#allocation7 + $0x90] sm:$0xff] }
  0x41   :  { %v337_v35 = vpack.c.bf16 %v169_v33, %v167_v32  ;;  %v171_v38 = vld [vmem:[#allocation7 + $0xa8] sm:$0xff]  ;;  %v173_v39 = vld [vmem:[#allocation7 + $0xb8] sm:$0xff]  ;;  %v339_v40 = vpack.c.bf16 %v168_v37, %v166_v36  ;;  %v170_v42 = vld [vmem:[#allocation7 + $0xa0] sm:$0xff] }
  0x42   :  { %328 = vmatpush1.bf16.msra.mxu1 %v327_v21  ;;  %v341_v41 = vpack.c.bf16 %v173_v39, %v171_v38  ;;  %v172_v43 = vld [vmem:[#allocation7 + $0xb0] sm:$0xff]  ;;  %v175_v44 = vld [vmem:[#allocation7 + $0xc8] sm:$0xff]  ;;  %v177_v45 = vld [vmem:[#allocation7 + $0xd8] sm:$0xff] }
  0x43   :  { %313 = vmatmul.mubr.msk.f32.vlgmr.msra.gmra.mrb[0].mxu0 %vm75_vm1, %v63_v22  ;;  %330 = vmatprep.subr.bf16.mxu1 %v329_v23  ;;  %v343_v46 = vpack.c.bf16 %v172_v43, %v170_v42  ;;  %v345_v47 = vpack.c.bf16 %v177_v45, %v175_v44  ;;  %v174_v48 = vld [vmem:[#allocation7 + $0xc0] sm:$0xff]  ;;  %v176_v49 = vld [vmem:[#allocation7 + $0xd0] sm:$0xff]  ;;  %v179_v51 = vld [vmem:[#allocation7 + $0xe8] sm:$0xff] }
  0x44   :  { %v347_v50 = vpack.c.bf16 %v176_v49, %v174_v48  ;;  %v181_v52 = vld [vmem:[#allocation7 + $0xf8] sm:$0xff]  ;;  %v178_v54 = vld [vmem:[#allocation7 + $0xe0] sm:$0xff]  ;;  %v180_v55 = vld [vmem:[#allocation7 + $0xf0] sm:$0xff] }
  0x45   :  { %v349_v53 = vpack.c.bf16 %v181_v52, %v179_v51  ;;  %v351_v56 = vpack.c.bf16 %v180_v55, %v178_v54  ;;  %v297_v57 = vld [vmem:[%s598_s2] ss:$0 sm:$0xff]  ;;  %s431_s2 = scalar_lea.vmem %s274_s15, 128 }
  0x46   :  { %332 = vmatpush1.bf16.msra.mxu1 %v331_v28  ;;  %v182_v1 = vld [vmem:[%s600_s4] sm:$0x3]  ;;  %p432_p10 = scmp.ne.s32.totalorder %s274_s15, %s431_s2  ;;  %p437_p12 = scmp.lt.s32.totalorder %s431_s2, %s431_s2 }
  0x47   :  { %334 = vmatprep.subr.bf16.mxu1 %v333_v29  ;;  %v187_v3 = vrot.slane %v182_v1, %v186_v0  ;;  %v191_v4 = vrot.slane %v182_v1, %v190_v2 }
  0x48   :  { %p438_p13 = por %p437_p12, %p436_p11 }
  0x4a   :  { %336 = vmatpush1.bf16.msra.mxu1 %v335_v34  ;;  %p439_p0 = pnand %p438_p13, %p432_p10 }
  0x4b   :  { %338 = vmatprep.subr.bf16.mxu1 %v337_v35 }
  0x4e   :  { %340 = vmatpush1.bf16.msra.mxu1 %v339_v40 }
  0x4f   :  { %342 = vmatprep.subr.bf16.mxu1 %v341_v41 }
  0x52   :  { %344 = vmatpush1.bf16.msra.mxu1 %v343_v46 }
  0x53   :  { %346 = vmatprep.subr.bf16.mxu1 %v345_v47 }
  0x56   :  { %348 = vmatpush1.bf16.msra.mxu1 %v347_v50 }
  0x57   :  { %350 = vmatprep.subr.bf16.mxu1 %v349_v53 }
  0x5a   :  { %352 = vmatpush1.bf16.msra.mxu1 %v351_v56 }
 0x116   :  { %v145_v58 = vpop.f32.mrb[0].mxu0 }
 0x117   :  { %v146_v59 = vadd.f32 %v297_v57, %v145_v58  ;;  %v314_v60 = vpop.f32.mrb[1].mxu0 }
 0x119   :  { %v149_v61 = vmax.f32 %v146_v59, 0.0 }
 0x11b   :  { %259 = vmatmul.mubr.f32.vlgmr.msra.gmra.mrb[0].mxu1 %v149_v61 }
 0x1ee   :  { %v260_v5 = vpop.f32.mrb[0].mxu1 }
 0x1ef   :  { %v261_v6 = vadd.f32 %v260_v5, %v187_v3  ;;  %v262_v7 = vpop.f32.mrb[1].mxu1 }
 0x1f0   :  { %v263_v8 = vadd.f32 %v262_v7, %v191_v4 }
 0x1f1   :  { %265 = vst [vmem:[#allocation8] sm:$0xff] %v261_v6 }
 0x1f2   :  { %266 = vst [vmem:[#allocation9] sm:$0xff] %v263_v8 }
 0x1f3   :  { %442 = shalt.err (!%p439_p0)
}
 0x1f4   :  { %s443_s19 = scalar_lea.hbm %s601_s5, 128 }
 0x1f5   :  { %p444_p1 = scmp.ne.s32.totalorder %s601_s5, %s443_s19  ;;  %p447_p2 = scmp.lt.u32.totalorder %s443_s19, %s601_s5 }
 0x1f7   :  { %p449_p3 = pnand %p447_p2, %p444_p1 }
 0x1f9   :  { %452 = shalt.err (!%p449_p3)
}
 0x1fa   :  { %276 = dma.vmem_to_hbm [thread:$0]  %s274_s15, 128, %s601_s5, [#allocation4]  }
 0x1fb   :  { %s453_s25 = scalar_lea.vmem %s284_s17, 128  ;;  %p458_p5 = scmp.lt.s32.totalorder %s284_s17, %s284_s17 }
 0x1fc   :  { %p454_p4 = scmp.ne.s32.totalorder %s284_s17, %s453_s25  ;;  %p459_p6 = scmp.lt.s32.totalorder %s453_s25, %s453_s25 }
 0x1fe   :  { %p460_p7 = por %p459_p6, %p458_p5 }
 0x200   :  { %p461_p8 = pnand %p460_p7, %p454_p4 }
 0x202   :  { %464 = shalt.err (!%p461_p8)
}
 0x203   :  { %s465_s28 = scalar_lea.hbm %s602_s6, 128 }
 0x204   :  { %p466_p9 = scmp.ne.s32.totalorder %s602_s6, %s465_s28  ;;  %p469_p10 = scmp.lt.u32.totalorder %s465_s28, %s602_s6 }
 0x206   :  { %p471_p11 = pnand %p469_p10, %p466_p9 }
 0x208   :  { %474 = shalt.err (!%p471_p11)
}
 0x209   :  { %286 = dma.vmem_to_hbm [thread:$0]  %s284_s17, 128, %s602_s6, [#allocation10]  }
 0x20a   :  { %479 = dma.done.wait [#allocation4], 128  }
 0x20b   :  { %480 = vsyncadd [#allocation4], 4294967168 }
 0x20c   :  { %481 = dma.done.wait [#allocation10], 128  }
 0x20d   :  { %482 = vsyncadd [#allocation10], 4294967168 }
 0x20e   :  { %293 = vsyncpa [#allocation3], 1 }
 0x20f   :  { %294 = vsyncpa [#allocation6], 1 }
 0x210   :  { %295 = vsyncpa [#allocation4], 1 }
 0x211   :  { %296 = vsyncpa [#allocation10], 1 }

</bundles_post_ra>
